<compile_context>
chip_gen: v5e
topology: v5e:2x2
jax: 0.10.0
libtpu: 0.0.40
codegen_flags: <defaults>
</compile_context>

<pallas_src>
import functools

import jax
import jax.numpy as jnp
from jax import lax
from jax.experimental import pallas as pl
from jax.experimental.pallas import tpu as pltpu


def _lstm_kernel(x_ref, w_ih_t_ref, w_hh_t_ref, b_gates_ref, w_fc_t_ref,
                 b_fc_ref, out_ref, pg_ref, h_all_ref, *,
                 seq_len, batch, hidden_dim):
    B = batch
    H = hidden_dim

    # ---- Hoisted, time-independent input projection (one batched matmul). ----
    # pre_gates[t*B + b, :] = x[t, b, :] @ W_ih^T + (b_ih + b_hh)
    pg_ref[...] = (
        jnp.dot(x_ref[...], w_ih_t_ref[...], preferred_element_type=jnp.float32)
        + b_gates_ref[...]
    )

    w_hh_t = w_hh_t_ref[...]          # (H, 4H), stays resident for all steps.

    # ---- Serial recurrence: only h @ W_hh^T + elementwise per step. ----
    def step(t, carry):
        h, c = carry
        row = pl.multiple_of(t * B, B)                      # sublane-aligned
        gates = pg_ref[pl.ds(row, B), :] + jnp.dot(
            h, w_hh_t, preferred_element_type=jnp.float32)  # (B, 4H)

        i_g = jax.nn.sigmoid(gates[:, 0 * H:1 * H])
        f_g = jax.nn.sigmoid(gates[:, 1 * H:2 * H])
        g_g = jnp.tanh(gates[:, 2 * H:3 * H])
        o_g = jax.nn.sigmoid(gates[:, 3 * H:4 * H])

        c_new = f_g * c + i_g * g_g
        h_new = o_g * jnp.tanh(c_new)

        h_all_ref[pl.ds(row, B), :] = h_new
        return h_new, c_new

    h0 = jnp.zeros((B, H), jnp.float32)
    c0 = jnp.zeros((B, H), jnp.float32)
    lax.fori_loop(0, seq_len, step, (h0, c0), unroll=True)

    # ---- Hoisted FC + log_softmax over all S*B rows (lane-dense store). ----
    logits = (
        jnp.dot(h_all_ref[...], w_fc_t_ref[...],
                preferred_element_type=jnp.float32)
        + b_fc_ref[...]
    )                                                        # (S*B, O_pad)
    m = jnp.max(logits, axis=-1, keepdims=True)
    shifted = logits - m
    lse = jnp.log(jnp.sum(jnp.exp(shifted), axis=-1, keepdims=True))
    out_ref[...] = shifted - lse


def lstm_pos_tagger_forward(token_ids, params):
    """token_ids: (B, S) int32.  Returns (B, S, output_dim) float32 log-probs."""
    emb = params["embedding"]        # (V, D)
    w_ih = params["w_ih"]            # (4H, D)
    w_hh = params["w_hh"]            # (4H, H)
    b_ih = params["b_ih"]            # (4H,)
    b_hh = params["b_hh"]            # (4H,)
    w_fc = params["w_fc"]            # (O, H)
    b_fc = params["b_fc"]            # (O,)

    B, S = token_ids.shape
    D = emb.shape[1]
    H = w_hh.shape[1]
    O = w_fc.shape[0]
    O_pad = ((O + 127) // 128) * 128

    # Glue (plain JAX): embedding gather emitted seq-major so no activation
    # transpose is needed; row t*B + b holds (batch b, time t).
    x_flat = emb[token_ids.T].reshape(S * B, D)          # (S*B, D)

    w_ih_t = w_ih.T                                      # (D, 4H)
    w_hh_t = w_hh.T                                      # (H, 4H)
    b_gates = (b_ih + b_hh).reshape(1, 4 * H)            # fused biases

    # Pad FC to 128 output lanes -> single unmasked output slab. Padded
    # classes get a huge negative bias so log_softmax ignores them.
    w_fc_t_pad = jnp.zeros((H, O_pad), jnp.float32).at[:, :O].set(w_fc.T)
    b_fc_pad = jnp.full((1, O_pad), -1e30, jnp.float32).at[0, :O].set(b_fc)

    kernel = functools.partial(_lstm_kernel, seq_len=S, batch=B, hidden_dim=H)

    out_flat = pl.pallas_call(
        kernel,
        out_shape=jax.ShapeDtypeStruct((S * B, O_pad), jnp.float32),
        grid_spec=pltpu.PrefetchScalarGridSpec(
            num_scalar_prefetch=0,
            grid=(1,),                         # single invocation; all in VMEM
            in_specs=[
                pl.BlockSpec((S * B, D), lambda i: (0, 0)),       # x_flat
                pl.BlockSpec((D, 4 * H), lambda i: (0, 0)),       # W_ih^T
                pl.BlockSpec((H, 4 * H), lambda i: (0, 0)),       # W_hh^T
                pl.BlockSpec((1, 4 * H), lambda i: (0, 0)),       # b_ih + b_hh
                pl.BlockSpec((H, O_pad), lambda i: (0, 0)),       # W_fc^T (pad)
                pl.BlockSpec((1, O_pad), lambda i: (0, 0)),       # b_fc (pad)
            ],
            out_specs=pl.BlockSpec((S * B, O_pad), lambda i: (0, 0)),
            scratch_shapes=[
                pltpu.VMEM((S * B, 4 * H), jnp.float32),   # pre-gates
                pltpu.VMEM((S * B, H), jnp.float32),       # all h_t
            ],
        ),
        compiler_params=pltpu.CompilerParams(
            dimension_semantics=("arbitrary",),   # recurrence is sequential
        ),
    )(x_flat, w_ih_t, w_hh_t, b_gates, w_fc_t_pad, b_fc_pad)

    # (S*B, O_pad) -> (B, S, O): drop pad lanes, un-flatten, batch-major.
    return out_flat[:, :O].reshape(S, B, O).transpose(1, 0, 2)


def _reference_forward(token_ids, params):
    """Pure-JAX reference matching the PyTorch module semantics."""
    emb, w_ih, w_hh = params["embedding"], params["w_ih"], params["w_hh"]
    b_ih, b_hh = params["b_ih"], params["b_hh"]
    w_fc, b_fc = params["w_fc"], params["b_fc"]
    B, S = token_ids.shape
    H = w_hh.shape[1]
    x = emb[token_ids]                                   # (B, S, D)
    h = jnp.zeros((B, H), jnp.float32)
    c = jnp.zeros((B, H), jnp.float32)
    hs = []
    for t in range(S):
        gates = x[:, t] @ w_ih.T + b_ih + h @ w_hh.T + b_hh
        i = jax.nn.sigmoid(gates[:, 0 * H:1 * H])
        f = jax.nn.sigmoid(gates[:, 1 * H:2 * H])
        g = jnp.tanh(gates[:, 2 * H:3 * H])
        o = jax.nn.sigmoid(gates[:, 3 * H:4 * H])
        c = f * c + i * g
        h = o * jnp.tanh(c)
        hs.append(h)
    hs = jnp.stack(hs, axis=1)                           # (B, S, H)
    logits = hs @ w_fc.T + b_fc
    return jax.nn.log_softmax(logits, axis=-1)


def init_params(key, vocab_size, input_dim, hidden_dim, output_dim):
    ks = jax.random.split(key, 7)
    bound = 1.0 / jnp.sqrt(hidden_dim)
    return {
        "embedding": jax.random.normal(ks[0], (vocab_size, input_dim), jnp.float32),
        "w_ih": jax.random.uniform(ks[1], (4 * hidden_dim, input_dim),
                                   jnp.float32, -bound, bound),
        "w_hh": jax.random.uniform(ks[2], (4 * hidden_dim, hidden_dim),
                                   jnp.float32, -bound, bound),
        "b_ih": jax.random.uniform(ks[3], (4 * hidden_dim,), jnp.float32, -bound, bound),
        "b_hh": jax.random.uniform(ks[4], (4 * hidden_dim,), jnp.float32, -bound, bound),
        "w_fc": jax.random.uniform(ks[5], (output_dim, hidden_dim),
                                   jnp.float32, -bound, bound),
        "b_fc": jax.random.uniform(ks[6], (output_dim,), jnp.float32, -bound, bound),
    }


if __name__ == "__main__":
    # Small shapes consistent with the module's forward pass.
    vocab_size = 50
    input_dim = 16
    hidden_dim = 32
    output_dim = 10
    batch_size = 8
    seq_len = 8

    key = jax.random.PRNGKey(0)
    k_ids, k_params = jax.random.split(key)
    token_ids = jax.random.randint(k_ids, (batch_size, seq_len), 0, vocab_size,
                                   dtype=jnp.int32)
    params = init_params(k_params, vocab_size, input_dim, hidden_dim, output_dim)

    out = jax.jit(lstm_pos_tagger_forward)(token_ids, params)   # (B, S, O)
    jax.block_until_ready(out)

    assert out.shape == (batch_size, seq_len, output_dim)
    # log_softmax rows should exponentiate-sum to 1.
    row_sums = jnp.sum(jnp.exp(out), axis=-1)
    assert bool(jnp.all(jnp.abs(row_sums - 1.0) < 1e-3))

    # Check against a pure-JAX reference of the same forward pass.
    ref = _reference_forward(token_ids, params)
    max_err = float(jnp.max(jnp.abs(out - ref)))
    assert max_err < 5e-2, f"max abs err vs reference: {max_err}"

    print("KERNEL_OK")
</pallas_src>

<mosaic_0001>
module attributes {stable_mosaic.version = 11 : i64} {
  func.func @_lstm_kernel(%arg0: i32, %arg1: memref<64x16xf32, #tpu.memory_space<vmem>>, %arg2: memref<16x128xf32, #tpu.memory_space<vmem>>, %arg3: memref<32x128xf32, #tpu.memory_space<vmem>>, %arg4: memref<1x128xf32, #tpu.memory_space<vmem>>, %arg5: memref<32x128xf32, #tpu.memory_space<vmem>>, %arg6: memref<1x128xf32, #tpu.memory_space<vmem>>, %arg7: memref<64x128xf32, #tpu.memory_space<vmem>>, %arg8: memref<64x128xf32, #tpu.memory_space<vmem>>, %arg9: memref<64x32xf32, #tpu.memory_space<vmem>>) attributes {dimension_semantics = [#tpu.dimension_semantics<arbitrary>], iteration_bounds = array<i64: 1>, scalar_prefetch = 0 : i64, scratch_operands = 2 : i64, tpu.core_type = #tpu.core_type<tc>, window_params = [{pipeline_mode = #tpu.pipeline_mode<synchronous>, transform_indices = @transform_0, window_bounds = array<i64: 64, 16>}, {pipeline_mode = #tpu.pipeline_mode<synchronous>, transform_indices = @transform_1, window_bounds = array<i64: 16, 128>}, {pipeline_mode = #tpu.pipeline_mode<synchronous>, transform_indices = @transform_2, window_bounds = array<i64: 32, 128>}, {pipeline_mode = #tpu.pipeline_mode<synchronous>, transform_indices = @transform_3, window_bounds = array<i64: 1, 128>}, {pipeline_mode = #tpu.pipeline_mode<synchronous>, transform_indices = @transform_4, window_bounds = array<i64: 32, 128>}, {pipeline_mode = #tpu.pipeline_mode<synchronous>, transform_indices = @transform_5, window_bounds = array<i64: 1, 128>}, {pipeline_mode = #tpu.pipeline_mode<synchronous>, transform_indices = @transform_6, window_bounds = array<i64: 64, 128>}]} {
    %c0 = arith.constant 0 : index
    %c0_0 = arith.constant 0 : index
    %0 = vector.load %arg1[%c0, %c0_0] : memref<64x16xf32, #tpu.memory_space<vmem>>, vector<64x16xf32>
    %c0_1 = arith.constant 0 : index
    %c0_2 = arith.constant 0 : index
    %1 = vector.load %arg2[%c0_1, %c0_2] : memref<16x128xf32, #tpu.memory_space<vmem>>, vector<16x128xf32>
    %cst = arith.constant dense<0.000000e+00> : vector<64x128xf32>
    %2 = tpu.matmul %0, %1, %cst {dimension_numbers = #tpu.dot_dimension_numbers<[1], [0], [0], [1], [0, 0, 1, 1], [], []>} : vector<64x16xf32>, vector<16x128xf32>, vector<64x128xf32> -> vector<64x128xf32>
    %c0_3 = arith.constant 0 : index
    %c0_4 = arith.constant 0 : index
    %3 = vector.load %arg4[%c0_3, %c0_4] : memref<1x128xf32, #tpu.memory_space<vmem>>, vector<1x128xf32>
    %4 = vector.broadcast %3 : vector<1x128xf32> to vector<64x128xf32>
    %5 = arith.addf %2, %4 : vector<64x128xf32>
    %c0_5 = arith.constant 0 : index
    %c0_6 = arith.constant 0 : index
    %6 = vector.load %arg8[%c0_5, %c0_6] : memref<64x128xf32, #tpu.memory_space<vmem>>, vector<64x128xf32>
    tpu.vector_store %arg8[%c0_5, %c0_6], %5 {strides = array<i32>} : memref<64x128xf32, #tpu.memory_space<vmem>>, vector<64x128xf32>,
    %c0_7 = arith.constant 0 : index
    %c0_8 = arith.constant 0 : index
    %7 = vector.load %arg3[%c0_7, %c0_8] : memref<32x128xf32, #tpu.memory_space<vmem>>, vector<32x128xf32>
    %cst_9 = arith.constant 0.000000e+00 : f32
    %8 = vector.broadcast %cst_9 : f32 to vector<8x32xf32>
    %cst_10 = arith.constant 0.000000e+00 : f32
    %9 = vector.broadcast %cst_10 : f32 to vector<8x32xf32>
    %c0_i32 = arith.constant 0 : i32
    %c8_i32 = arith.constant 8 : i32
    %10 = arith.muli %c0_i32, %c8_i32 : i32
    %11 = tpu.assume_multiple %10, 8 : i32
    %12 = arith.index_cast %11 : i32 to index
    %c0_11 = arith.constant 0 : index
    %13 = vector.load %arg8[%12, %c0_11] : memref<64x128xf32, #tpu.memory_space<vmem>>, vector<8x128xf32>
    %cst_12 = arith.constant dense<0.000000e+00> : vector<8x128xf32>
    %14 = tpu.matmul %8, %7, %cst_12 {dimension_numbers = #tpu.dot_dimension_numbers<[1], [0], [0], [1], [0, 0, 1, 1], [], []>} : vector<8x32xf32>, vector<32x128xf32>, vector<8x128xf32> -> vector<8x128xf32>
    %15 = arith.addf %13, %14 : vector<8x128xf32>
    %16 = vector.extract_strided_slice %15 {offsets = [0, 0], sizes = [8, 32], strides = [1, 1]} : vector<8x128xf32> to vector<8x32xf32>
    %17 = arith.negf %16 : vector<8x32xf32>
    %18 = math.exp %17 : vector<8x32xf32>
    %cst_13 = arith.constant 1.000000e+00 : f32
    %19 = vector.broadcast %cst_13 : f32 to vector<8x32xf32>
    %20 = arith.addf %19, %18 : vector<8x32xf32>
    %21 = arith.divf %19, %20 : vector<8x32xf32>
    %22 = vector.extract_strided_slice %15 {offsets = [0, 32], sizes = [8, 32], strides = [1, 1]} : vector<8x128xf32> to vector<8x32xf32>
    %23 = arith.negf %22 : vector<8x32xf32>
    %24 = math.exp %23 : vector<8x32xf32>
    %cst_14 = arith.constant 1.000000e+00 : f32
    %25 = vector.broadcast %cst_14 : f32 to vector<8x32xf32>
    %26 = arith.addf %25, %24 : vector<8x32xf32>
    %27 = arith.divf %25, %26 : vector<8x32xf32>
    %28 = vector.extract_strided_slice %15 {offsets = [0, 64], sizes = [8, 32], strides = [1, 1]} : vector<8x128xf32> to vector<8x32xf32>
    %29 = math.tanh %28 : vector<8x32xf32>
    %30 = vector.extract_strided_slice %15 {offsets = [0, 96], sizes = [8, 32], strides = [1, 1]} : vector<8x128xf32> to vector<8x32xf32>
    %31 = arith.negf %30 : vector<8x32xf32>
    %32 = math.exp %31 : vector<8x32xf32>
    %cst_15 = arith.constant 1.000000e+00 : f32
    %33 = vector.broadcast %cst_15 : f32 to vector<8x32xf32>
    %34 = arith.addf %33, %32 : vector<8x32xf32>
    %35 = arith.divf %33, %34 : vector<8x32xf32>
    %36 = arith.mulf %27, %9 : vector<8x32xf32>
    %37 = arith.mulf %21, %29 : vector<8x32xf32>
    %38 = arith.addf %36, %37 : vector<8x32xf32>
    %39 = math.tanh %38 : vector<8x32xf32>
    %40 = arith.mulf %35, %39 : vector<8x32xf32>
    %41 = arith.index_cast %11 : i32 to index
    %c0_16 = arith.constant 0 : index
    %42 = vector.load %arg9[%41, %c0_16] : memref<64x32xf32, #tpu.memory_space<vmem>>, vector<8x32xf32>
    tpu.vector_store %arg9[%41, %c0_16], %40 {strides = array<i32>} : memref<64x32xf32, #tpu.memory_space<vmem>>, vector<8x32xf32>,
    %c1_i32 = arith.constant 1 : i32
    %c8_i32_17 = arith.constant 8 : i32
    %43 = arith.muli %c1_i32, %c8_i32_17 : i32
    %44 = tpu.assume_multiple %43, 8 : i32
    %45 = arith.index_cast %44 : i32 to index
    %c0_18 = arith.constant 0 : index
    %46 = vector.load %arg8[%45, %c0_18] : memref<64x128xf32, #tpu.memory_space<vmem>>, vector<8x128xf32>
    %cst_19 = arith.constant dense<0.000000e+00> : vector<8x128xf32>
    %47 = tpu.matmul %40, %7, %cst_19 {dimension_numbers = #tpu.dot_dimension_numbers<[1], [0], [0], [1], [0, 0, 1, 1], [], []>} : vector<8x32xf32>, vector<32x128xf32>, vector<8x128xf32> -> vector<8x128xf32>
    %48 = arith.addf %46, %47 : vector<8x128xf32>
    %49 = vector.extract_strided_slice %48 {offsets = [0, 0], sizes = [8, 32], strides = [1, 1]} : vector<8x128xf32> to vector<8x32xf32>
    %50 = arith.negf %49 : vector<8x32xf32>
    %51 = math.exp %50 : vector<8x32xf32>
    %cst_20 = arith.constant 1.000000e+00 : f32
    %52 = vector.broadcast %cst_20 : f32 to vector<8x32xf32>
    %53 = arith.addf %52, %51 : vector<8x32xf32>
    %54 = arith.divf %52, %53 : vector<8x32xf32>
    %55 = vector.extract_strided_slice %48 {offsets = [0, 32], sizes = [8, 32], strides = [1, 1]} : vector<8x128xf32> to vector<8x32xf32>
    %56 = arith.negf %55 : vector<8x32xf32>
    %57 = math.exp %56 : vector<8x32xf32>
    %cst_21 = arith.constant 1.000000e+00 : f32
    %58 = vector.broadcast %cst_21 : f32 to vector<8x32xf32>
    %59 = arith.addf %58, %57 : vector<8x32xf32>
    %60 = arith.divf %58, %59 : vector<8x32xf32>
    %61 = vector.extract_strided_slice %48 {offsets = [0, 64], sizes = [8, 32], strides = [1, 1]} : vector<8x128xf32> to vector<8x32xf32>
    %62 = math.tanh %61 : vector<8x32xf32>
    %63 = vector.extract_strided_slice %48 {offsets = [0, 96], sizes = [8, 32], strides = [1, 1]} : vector<8x128xf32> to vector<8x32xf32>
    %64 = arith.negf %63 : vector<8x32xf32>
    %65 = math.exp %64 : vector<8x32xf32>
    %cst_22 = arith.constant 1.000000e+00 : f32
    %66 = vector.broadcast %cst_22 : f32 to vector<8x32xf32>
    %67 = arith.addf %66, %65 : vector<8x32xf32>
    %68 = arith.divf %66, %67 : vector<8x32xf32>
    %69 = arith.mulf %60, %38 : vector<8x32xf32>
    %70 = arith.mulf %54, %62 : vector<8x32xf32>
    %71 = arith.addf %69, %70 : vector<8x32xf32>
    %72 = math.tanh %71 : vector<8x32xf32>
    %73 = arith.mulf %68, %72 : vector<8x32xf32>
    %74 = arith.index_cast %44 : i32 to index
    %c0_23 = arith.constant 0 : index
    %75 = vector.load %arg9[%74, %c0_23] : memref<64x32xf32, #tpu.memory_space<vmem>>, vector<8x32xf32>
    tpu.vector_store %arg9[%74, %c0_23], %73 {strides = array<i32>} : memref<64x32xf32, #tpu.memory_space<vmem>>, vector<8x32xf32>,
    %c2_i32 = arith.constant 2 : i32
    %c8_i32_24 = arith.constant 8 : i32
    %76 = arith.muli %c2_i32, %c8_i32_24 : i32
    %77 = tpu.assume_multiple %76, 8 : i32
    %78 = arith.index_cast %77 : i32 to index
    %c0_25 = arith.constant 0 : index
    %79 = vector.load %arg8[%78, %c0_25] : memref<64x128xf32, #tpu.memory_space<vmem>>, vector<8x128xf32>
    %cst_26 = arith.constant dense<0.000000e+00> : vector<8x128xf32>
    %80 = tpu.matmul %73, %7, %cst_26 {dimension_numbers = #tpu.dot_dimension_numbers<[1], [0], [0], [1], [0, 0, 1, 1], [], []>} : vector<8x32xf32>, vector<32x128xf32>, vector<8x128xf32> -> vector<8x128xf32>
    %81 = arith.addf %79, %80 : vector<8x128xf32>
    %82 = vector.extract_strided_slice %81 {offsets = [0, 0], sizes = [8, 32], strides = [1, 1]} : vector<8x128xf32> to vector<8x32xf32>
    %83 = arith.negf %82 : vector<8x32xf32>
    %84 = math.exp %83 : vector<8x32xf32>
    %cst_27 = arith.constant 1.000000e+00 : f32
    %85 = vector.broadcast %cst_27 : f32 to vector<8x32xf32>
    %86 = arith.addf %85, %84 : vector<8x32xf32>
    %87 = arith.divf %85, %86 : vector<8x32xf32>
    %88 = vector.extract_strided_slice %81 {offsets = [0, 32], sizes = [8, 32], strides = [1, 1]} : vector<8x128xf32> to vector<8x32xf32>
    %89 = arith.negf %88 : vector<8x32xf32>
    %90 = math.exp %89 : vector<8x32xf32>
    %cst_28 = arith.constant 1.000000e+00 : f32
    %91 = vector.broadcast %cst_28 : f32 to vector<8x32xf32>
    %92 = arith.addf %91, %90 : vector<8x32xf32>
    %93 = arith.divf %91, %92 : vector<8x32xf32>
    %94 = vector.extract_strided_slice %81 {offsets = [0, 64], sizes = [8, 32], strides = [1, 1]} : vector<8x128xf32> to vector<8x32xf32>
    %95 = math.tanh %94 : vector<8x32xf32>
    %96 = vector.extract_strided_slice %81 {offsets = [0, 96], sizes = [8, 32], strides = [1, 1]} : vector<8x128xf32> to vector<8x32xf32>
    %97 = arith.negf %96 : vector<8x32xf32>
    %98 = math.exp %97 : vector<8x32xf32>
    %cst_29 = arith.constant 1.000000e+00 : f32
    %99 = vector.broadcast %cst_29 : f32 to vector<8x32xf32>
    %100 = arith.addf %99, %98 : vector<8x32xf32>
    %101 = arith.divf %99, %100 : vector<8x32xf32>
    %102 = arith.mulf %93, %71 : vector<8x32xf32>
    %103 = arith.mulf %87, %95 : vector<8x32xf32>
    %104 = arith.addf %102, %103 : vector<8x32xf32>
    %105 = math.tanh %104 : vector<8x32xf32>
    %106 = arith.mulf %101, %105 : vector<8x32xf32>
    %107 = arith.index_cast %77 : i32 to index
    %c0_30 = arith.constant 0 : index
    %108 = vector.load %arg9[%107, %c0_30] : memref<64x32xf32, #tpu.memory_space<vmem>>, vector<8x32xf32>
    tpu.vector_store %arg9[%107, %c0_30], %106 {strides = array<i32>} : memref<64x32xf32, #tpu.memory_space<vmem>>, vector<8x32xf32>,
    %c3_i32 = arith.constant 3 : i32
    %c8_i32_31 = arith.constant 8 : i32
    %109 = arith.muli %c3_i32, %c8_i32_31 : i32
    %110 = tpu.assume_multiple %109, 8 : i32
    %111 = arith.index_cast %110 : i32 to index
    %c0_32 = arith.constant 0 : index
    %112 = vector.load %arg8[%111, %c0_32] : memref<64x128xf32, #tpu.memory_space<vmem>>, vector<8x128xf32>
    %cst_33 = arith.constant dense<0.000000e+00> : vector<8x128xf32>
    %113 = tpu.matmul %106, %7, %cst_33 {dimension_numbers = #tpu.dot_dimension_numbers<[1], [0], [0], [1], [0, 0, 1, 1], [], []>} : vector<8x32xf32>, vector<32x128xf32>, vector<8x128xf32> -> vector<8x128xf32>
    %114 = arith.addf %112, %113 : vector<8x128xf32>
    %115 = vector.extract_strided_slice %114 {offsets = [0, 0], sizes = [8, 32], strides = [1, 1]} : vector<8x128xf32> to vector<8x32xf32>
    %116 = arith.negf %115 : vector<8x32xf32>
    %117 = math.exp %116 : vector<8x32xf32>
    %cst_34 = arith.constant 1.000000e+00 : f32
    %118 = vector.broadcast %cst_34 : f32 to vector<8x32xf32>
    %119 = arith.addf %118, %117 : vector<8x32xf32>
    %120 = arith.divf %118, %119 : vector<8x32xf32>
    %121 = vector.extract_strided_slice %114 {offsets = [0, 32], sizes = [8, 32], strides = [1, 1]} : vector<8x128xf32> to vector<8x32xf32>
    %122 = arith.negf %121 : vector<8x32xf32>
    %123 = math.exp %122 : vector<8x32xf32>
    %cst_35 = arith.constant 1.000000e+00 : f32
    %124 = vector.broadcast %cst_35 : f32 to vector<8x32xf32>
    %125 = arith.addf %124, %123 : vector<8x32xf32>
    %126 = arith.divf %124, %125 : vector<8x32xf32>
    %127 = vector.extract_strided_slice %114 {offsets = [0, 64], sizes = [8, 32], strides = [1, 1]} : vector<8x128xf32> to vector<8x32xf32>
    %128 = math.tanh %127 : vector<8x32xf32>
    %129 = vector.extract_strided_slice %114 {offsets = [0, 96], sizes = [8, 32], strides = [1, 1]} : vector<8x128xf32> to vector<8x32xf32>
    %130 = arith.negf %129 : vector<8x32xf32>
    %131 = math.exp %130 : vector<8x32xf32>
    %cst_36 = arith.constant 1.000000e+00 : f32
    %132 = vector.broadcast %cst_36 : f32 to vector<8x32xf32>
    %133 = arith.addf %132, %131 : vector<8x32xf32>
    %134 = arith.divf %132, %133 : vector<8x32xf32>
    %135 = arith.mulf %126, %104 : vector<8x32xf32>
    %136 = arith.mulf %120, %128 : vector<8x32xf32>
    %137 = arith.addf %135, %136 : vector<8x32xf32>
    %138 = math.tanh %137 : vector<8x32xf32>
    %139 = arith.mulf %134, %138 : vector<8x32xf32>
    %140 = arith.index_cast %110 : i32 to index
    %c0_37 = arith.constant 0 : index
    %141 = vector.load %arg9[%140, %c0_37] : memref<64x32xf32, #tpu.memory_space<vmem>>, vector<8x32xf32>
    tpu.vector_store %arg9[%140, %c0_37], %139 {strides = array<i32>} : memref<64x32xf32, #tpu.memory_space<vmem>>, vector<8x32xf32>,
    %c4_i32 = arith.constant 4 : i32
    %c8_i32_38 = arith.constant 8 : i32
    %142 = arith.muli %c4_i32, %c8_i32_38 : i32
    %143 = tpu.assume_multiple %142, 8 : i32
    %144 = arith.index_cast %143 : i32 to index
    %c0_39 = arith.constant 0 : index
    %145 = vector.load %arg8[%144, %c0_39] : memref<64x128xf32, #tpu.memory_space<vmem>>, vector<8x128xf32>
    %cst_40 = arith.constant dense<0.000000e+00> : vector<8x128xf32>
    %146 = tpu.matmul %139, %7, %cst_40 {dimension_numbers = #tpu.dot_dimension_numbers<[1], [0], [0], [1], [0, 0, 1, 1], [], []>} : vector<8x32xf32>, vector<32x128xf32>, vector<8x128xf32> -> vector<8x128xf32>
    %147 = arith.addf %145, %146 : vector<8x128xf32>
    %148 = vector.extract_strided_slice %147 {offsets = [0, 0], sizes = [8, 32], strides = [1, 1]} : vector<8x128xf32> to vector<8x32xf32>
    %149 = arith.negf %148 : vector<8x32xf32>
    %150 = math.exp %149 : vector<8x32xf32>
    %cst_41 = arith.constant 1.000000e+00 : f32
    %151 = vector.broadcast %cst_41 : f32 to vector<8x32xf32>
    %152 = arith.addf %151, %150 : vector<8x32xf32>
    %153 = arith.divf %151, %152 : vector<8x32xf32>
    %154 = vector.extract_strided_slice %147 {offsets = [0, 32], sizes = [8, 32], strides = [1, 1]} : vector<8x128xf32> to vector<8x32xf32>
    %155 = arith.negf %154 : vector<8x32xf32>
    %156 = math.exp %155 : vector<8x32xf32>
    %cst_42 = arith.constant 1.000000e+00 : f32
    %157 = vector.broadcast %cst_42 : f32 to vector<8x32xf32>
    %158 = arith.addf %157, %156 : vector<8x32xf32>
    %159 = arith.divf %157, %158 : vector<8x32xf32>
    %160 = vector.extract_strided_slice %147 {offsets = [0, 64], sizes = [8, 32], strides = [1, 1]} : vector<8x128xf32> to vector<8x32xf32>
    %161 = math.tanh %160 : vector<8x32xf32>
    %162 = vector.extract_strided_slice %147 {offsets = [0, 96], sizes = [8, 32], strides = [1, 1]} : vector<8x128xf32> to vector<8x32xf32>
    %163 = arith.negf %162 : vector<8x32xf32>
    %164 = math.exp %163 : vector<8x32xf32>
    %cst_43 = arith.constant 1.000000e+00 : f32
    %165 = vector.broadcast %cst_43 : f32 to vector<8x32xf32>
    %166 = arith.addf %165, %164 : vector<8x32xf32>
    %167 = arith.divf %165, %166 : vector<8x32xf32>
    %168 = arith.mulf %159, %137 : vector<8x32xf32>
    %169 = arith.mulf %153, %161 : vector<8x32xf32>
    %170 = arith.addf %168, %169 : vector<8x32xf32>
    %171 = math.tanh %170 : vector<8x32xf32>
    %172 = arith.mulf %167, %171 : vector<8x32xf32>
    %173 = arith.index_cast %143 : i32 to index
    %c0_44 = arith.constant 0 : index
    %174 = vector.load %arg9[%173, %c0_44] : memref<64x32xf32, #tpu.memory_space<vmem>>, vector<8x32xf32>
    tpu.vector_store %arg9[%173, %c0_44], %172 {strides = array<i32>} : memref<64x32xf32, #tpu.memory_space<vmem>>, vector<8x32xf32>,
    %c5_i32 = arith.constant 5 : i32
    %c8_i32_45 = arith.constant 8 : i32
    %175 = arith.muli %c5_i32, %c8_i32_45 : i32
    %176 = tpu.assume_multiple %175, 8 : i32
    %177 = arith.index_cast %176 : i32 to index
    %c0_46 = arith.constant 0 : index
    %178 = vector.load %arg8[%177, %c0_46] : memref<64x128xf32, #tpu.memory_space<vmem>>, vector<8x128xf32>
    %cst_47 = arith.constant dense<0.000000e+00> : vector<8x128xf32>
    %179 = tpu.matmul %172, %7, %cst_47 {dimension_numbers = #tpu.dot_dimension_numbers<[1], [0], [0], [1], [0, 0, 1, 1], [], []>} : vector<8x32xf32>, vector<32x128xf32>, vector<8x128xf32> -> vector<8x128xf32>
    %180 = arith.addf %178, %179 : vector<8x128xf32>
    %181 = vector.extract_strided_slice %180 {offsets = [0, 0], sizes = [8, 32], strides = [1, 1]} : vector<8x128xf32> to vector<8x32xf32>
    %182 = arith.negf %181 : vector<8x32xf32>
    %183 = math.exp %182 : vector<8x32xf32>
    %cst_48 = arith.constant 1.000000e+00 : f32
    %184 = vector.broadcast %cst_48 : f32 to vector<8x32xf32>
    %185 = arith.addf %184, %183 : vector<8x32xf32>
    %186 = arith.divf %184, %185 : vector<8x32xf32>
    %187 = vector.extract_strided_slice %180 {offsets = [0, 32], sizes = [8, 32], strides = [1, 1]} : vector<8x128xf32> to vector<8x32xf32>
    %188 = arith.negf %187 : vector<8x32xf32>
    %189 = math.exp %188 : vector<8x32xf32>
    %cst_49 = arith.constant 1.000000e+00 : f32
    %190 = vector.broadcast %cst_49 : f32 to vector<8x32xf32>
    %191 = arith.addf %190, %189 : vector<8x32xf32>
    %192 = arith.divf %190, %191 : vector<8x32xf32>
    %193 = vector.extract_strided_slice %180 {offsets = [0, 64], sizes = [8, 32], strides = [1, 1]} : vector<8x128xf32> to vector<8x32xf32>
    %194 = math.tanh %193 : vector<8x32xf32>
    %195 = vector.extract_strided_slice %180 {offsets = [0, 96], sizes = [8, 32], strides = [1, 1]} : vector<8x128xf32> to vector<8x32xf32>
    %196 = arith.negf %195 : vector<8x32xf32>
    %197 = math.exp %196 : vector<8x32xf32>
    %cst_50 = arith.constant 1.000000e+00 : f32
    %198 = vector.broadcast %cst_50 : f32 to vector<8x32xf32>
    %199 = arith.addf %198, %197 : vector<8x32xf32>
    %200 = arith.divf %198, %199 : vector<8x32xf32>
    %201 = arith.mulf %192, %170 : vector<8x32xf32>
    %202 = arith.mulf %186, %194 : vector<8x32xf32>
    %203 = arith.addf %201, %202 : vector<8x32xf32>
    %204 = math.tanh %203 : vector<8x32xf32>
    %205 = arith.mulf %200, %204 : vector<8x32xf32>
    %206 = arith.index_cast %176 : i32 to index
    %c0_51 = arith.constant 0 : index
    %207 = vector.load %arg9[%206, %c0_51] : memref<64x32xf32, #tpu.memory_space<vmem>>, vector<8x32xf32>
    tpu.vector_store %arg9[%206, %c0_51], %205 {strides = array<i32>} : memref<64x32xf32, #tpu.memory_space<vmem>>, vector<8x32xf32>,
    %c6_i32 = arith.constant 6 : i32
    %c8_i32_52 = arith.constant 8 : i32
    %208 = arith.muli %c6_i32, %c8_i32_52 : i32
    %209 = tpu.assume_multiple %208, 8 : i32
    %210 = arith.index_cast %209 : i32 to index
    %c0_53 = arith.constant 0 : index
    %211 = vector.load %arg8[%210, %c0_53] : memref<64x128xf32, #tpu.memory_space<vmem>>, vector<8x128xf32>
    %cst_54 = arith.constant dense<0.000000e+00> : vector<8x128xf32>
    %212 = tpu.matmul %205, %7, %cst_54 {dimension_numbers = #tpu.dot_dimension_numbers<[1], [0], [0], [1], [0, 0, 1, 1], [], []>} : vector<8x32xf32>, vector<32x128xf32>, vector<8x128xf32> -> vector<8x128xf32>
    %213 = arith.addf %211, %212 : vector<8x128xf32>
    %214 = vector.extract_strided_slice %213 {offsets = [0, 0], sizes = [8, 32], strides = [1, 1]} : vector<8x128xf32> to vector<8x32xf32>
    %215 = arith.negf %214 : vector<8x32xf32>
    %216 = math.exp %215 : vector<8x32xf32>
    %cst_55 = arith.constant 1.000000e+00 : f32
    %217 = vector.broadcast %cst_55 : f32 to vector<8x32xf32>
    %218 = arith.addf %217, %216 : vector<8x32xf32>
    %219 = arith.divf %217, %218 : vector<8x32xf32>
    %220 = vector.extract_strided_slice %213 {offsets = [0, 32], sizes = [8, 32], strides = [1, 1]} : vector<8x128xf32> to vector<8x32xf32>
    %221 = arith.negf %220 : vector<8x32xf32>
    %222 = math.exp %221 : vector<8x32xf32>
    %cst_56 = arith.constant 1.000000e+00 : f32
    %223 = vector.broadcast %cst_56 : f32 to vector<8x32xf32>
    %224 = arith.addf %223, %222 : vector<8x32xf32>
    %225 = arith.divf %223, %224 : vector<8x32xf32>
    %226 = vector.extract_strided_slice %213 {offsets = [0, 64], sizes = [8, 32], strides = [1, 1]} : vector<8x128xf32> to vector<8x32xf32>
    %227 = math.tanh %226 : vector<8x32xf32>
    %228 = vector.extract_strided_slice %213 {offsets = [0, 96], sizes = [8, 32], strides = [1, 1]} : vector<8x128xf32> to vector<8x32xf32>
    %229 = arith.negf %228 : vector<8x32xf32>
    %230 = math.exp %229 : vector<8x32xf32>
    %cst_57 = arith.constant 1.000000e+00 : f32
    %231 = vector.broadcast %cst_57 : f32 to vector<8x32xf32>
    %232 = arith.addf %231, %230 : vector<8x32xf32>
    %233 = arith.divf %231, %232 : vector<8x32xf32>
    %234 = arith.mulf %225, %203 : vector<8x32xf32>
    %235 = arith.mulf %219, %227 : vector<8x32xf32>
    %236 = arith.addf %234, %235 : vector<8x32xf32>
    %237 = math.tanh %236 : vector<8x32xf32>
    %238 = arith.mulf %233, %237 : vector<8x32xf32>
    %239 = arith.index_cast %209 : i32 to index
    %c0_58 = arith.constant 0 : index
    %240 = vector.load %arg9[%239, %c0_58] : memref<64x32xf32, #tpu.memory_space<vmem>>, vector<8x32xf32>
    tpu.vector_store %arg9[%239, %c0_58], %238 {strides = array<i32>} : memref<64x32xf32, #tpu.memory_space<vmem>>, vector<8x32xf32>,
    %c7_i32 = arith.constant 7 : i32
    %c8_i32_59 = arith.constant 8 : i32
    %241 = arith.muli %c7_i32, %c8_i32_59 : i32
    %242 = tpu.assume_multiple %241, 8 : i32
    %243 = arith.index_cast %242 : i32 to index
    %c0_60 = arith.constant 0 : index
    %244 = vector.load %arg8[%243, %c0_60] : memref<64x128xf32, #tpu.memory_space<vmem>>, vector<8x128xf32>
    %cst_61 = arith.constant dense<0.000000e+00> : vector<8x128xf32>
    %245 = tpu.matmul %238, %7, %cst_61 {dimension_numbers = #tpu.dot_dimension_numbers<[1], [0], [0], [1], [0, 0, 1, 1], [], []>} : vector<8x32xf32>, vector<32x128xf32>, vector<8x128xf32> -> vector<8x128xf32>
    %246 = arith.addf %244, %245 : vector<8x128xf32>
    %247 = vector.extract_strided_slice %246 {offsets = [0, 0], sizes = [8, 32], strides = [1, 1]} : vector<8x128xf32> to vector<8x32xf32>
    %248 = arith.negf %247 : vector<8x32xf32>
    %249 = math.exp %248 : vector<8x32xf32>
    %cst_62 = arith.constant 1.000000e+00 : f32
    %250 = vector.broadcast %cst_62 : f32 to vector<8x32xf32>
    %251 = arith.addf %250, %249 : vector<8x32xf32>
    %252 = arith.divf %250, %251 : vector<8x32xf32>
    %253 = vector.extract_strided_slice %246 {offsets = [0, 32], sizes = [8, 32], strides = [1, 1]} : vector<8x128xf32> to vector<8x32xf32>
    %254 = arith.negf %253 : vector<8x32xf32>
    %255 = math.exp %254 : vector<8x32xf32>
    %cst_63 = arith.constant 1.000000e+00 : f32
    %256 = vector.broadcast %cst_63 : f32 to vector<8x32xf32>
    %257 = arith.addf %256, %255 : vector<8x32xf32>
    %258 = arith.divf %256, %257 : vector<8x32xf32>
    %259 = vector.extract_strided_slice %246 {offsets = [0, 64], sizes = [8, 32], strides = [1, 1]} : vector<8x128xf32> to vector<8x32xf32>
    %260 = math.tanh %259 : vector<8x32xf32>
    %261 = vector.extract_strided_slice %246 {offsets = [0, 96], sizes = [8, 32], strides = [1, 1]} : vector<8x128xf32> to vector<8x32xf32>
    %262 = arith.negf %261 : vector<8x32xf32>
    %263 = math.exp %262 : vector<8x32xf32>
    %cst_64 = arith.constant 1.000000e+00 : f32
    %264 = vector.broadcast %cst_64 : f32 to vector<8x32xf32>
    %265 = arith.addf %264, %263 : vector<8x32xf32>
    %266 = arith.divf %264, %265 : vector<8x32xf32>
    %267 = arith.mulf %258, %236 : vector<8x32xf32>
    %268 = arith.mulf %252, %260 : vector<8x32xf32>
    %269 = arith.addf %267, %268 : vector<8x32xf32>
    %270 = math.tanh %269 : vector<8x32xf32>
    %271 = arith.mulf %266, %270 : vector<8x32xf32>
    %272 = arith.index_cast %242 : i32 to index
    %c0_65 = arith.constant 0 : index
    %273 = vector.load %arg9[%272, %c0_65] : memref<64x32xf32, #tpu.memory_space<vmem>>, vector<8x32xf32>
    tpu.vector_store %arg9[%272, %c0_65], %271 {strides = array<i32>} : memref<64x32xf32, #tpu.memory_space<vmem>>, vector<8x32xf32>,
    %c8_i32_66 = arith.constant 8 : i32
    %c0_67 = arith.constant 0 : index
    %c0_68 = arith.constant 0 : index
    %274 = vector.load %arg9[%c0_67, %c0_68] : memref<64x32xf32, #tpu.memory_space<vmem>>, vector<64x32xf32>
    %c0_69 = arith.constant 0 : index
    %c0_70 = arith.constant 0 : index
    %275 = vector.load %arg5[%c0_69, %c0_70] : memref<32x128xf32, #tpu.memory_space<vmem>>, vector<32x128xf32>
    %cst_71 = arith.constant dense<0.000000e+00> : vector<64x128xf32>
    %276 = tpu.matmul %274, %275, %cst_71 {dimension_numbers = #tpu.dot_dimension_numbers<[1], [0], [0], [1], [0, 0, 1, 1], [], []>} : vector<64x32xf32>, vector<32x128xf32>, vector<64x128xf32> -> vector<64x128xf32>
    %c0_72 = arith.constant 0 : index
    %c0_73 = arith.constant 0 : index
    %277 = vector.load %arg6[%c0_72, %c0_73] : memref<1x128xf32, #tpu.memory_space<vmem>>, vector<1x128xf32>
    %278 = vector.broadcast %277 : vector<1x128xf32> to vector<64x128xf32>
    %279 = arith.addf %276, %278 : vector<64x128xf32>
    %cst_74 = arith.constant dense<0xFF800000> : vector<64xf32>
    %280 = vector.multi_reduction <maximumf>, %279, %cst_74 [1] : vector<64x128xf32> to vector<64xf32>
    %281 = vector.shape_cast %280 : vector<64xf32> to vector<64x1xf32>
    %282 = vector.broadcast %281 : vector<64x1xf32> to vector<64x128xf32>
    %283 = arith.subf %279, %282 : vector<64x128xf32>
    %284 = math.exp %283 : vector<64x128xf32>
    %cst_75 = arith.constant dense<0.000000e+00> : vector<64xf32>
    %285 = vector.multi_reduction <add>, %284, %cst_75 [1] : vector<64x128xf32> to vector<64xf32>
    %286 = vector.shape_cast %285 : vector<64xf32> to vector<64x1xf32>
    %287 = math.log %286 : vector<64x1xf32>
    %288 = vector.broadcast %287 : vector<64x1xf32> to vector<64x128xf32>
    %289 = arith.subf %283, %288 : vector<64x128xf32>
    %c0_76 = arith.constant 0 : index
    %c0_77 = arith.constant 0 : index
    %290 = vector.load %arg7[%c0_76, %c0_77] : memref<64x128xf32, #tpu.memory_space<vmem>>, vector<64x128xf32>
    tpu.vector_store %arg7[%c0_76, %c0_77], %289 {strides = array<i32>} : memref<64x128xf32, #tpu.memory_space<vmem>>, vector<64x128xf32>,
    return
  }
  func.func @transform_0(%arg0: i32) -> (i32, i32) {
    %c0_i32 = arith.constant 0 : i32
    %c0_i32_0 = arith.constant 0 : i32
    %c0_i32_1 = arith.constant 0 : i32
    return %c0_i32, %c0_i32_0 : i32, i32
  }
  func.func @transform_1(%arg0: i32) -> (i32, i32) {
    %c0_i32 = arith.constant 0 : i32
    %c0_i32_0 = arith.constant 0 : i32
    %c0_i32_1 = arith.constant 0 : i32
    return %c0_i32, %c0_i32_0 : i32, i32
  }
  func.func @transform_2(%arg0: i32) -> (i32, i32) {
    %c0_i32 = arith.constant 0 : i32
    %c0_i32_0 = arith.constant 0 : i32
    %c0_i32_1 = arith.constant 0 : i32
    return %c0_i32, %c0_i32_0 : i32, i32
  }
  func.func @transform_3(%arg0: i32) -> (i32, i32) {
    %c0_i32 = arith.constant 0 : i32
    %c0_i32_0 = arith.constant 0 : i32
    %c0_i32_1 = arith.constant 0 : i32
    return %c0_i32, %c0_i32_0 : i32, i32
  }
  func.func @transform_4(%arg0: i32) -> (i32, i32) {
    %c0_i32 = arith.constant 0 : i32
    %c0_i32_0 = arith.constant 0 : i32
    %c0_i32_1 = arith.constant 0 : i32
    return %c0_i32, %c0_i32_0 : i32, i32
  }
  func.func @transform_5(%arg0: i32) -> (i32, i32) {
    %c0_i32 = arith.constant 0 : i32
    %c0_i32_0 = arith.constant 0 : i32
    %c0_i32_1 = arith.constant 0 : i32
    return %c0_i32, %c0_i32_0 : i32, i32
  }
  func.func @transform_6(%arg0: i32) -> (i32, i32) {
    %c0_i32 = arith.constant 0 : i32
    %c0_i32_0 = arith.constant 0 : i32
    %c0_i32_1 = arith.constant 0 : i32
    return %c0_i32, %c0_i32_0 : i32, i32
  }
}

</mosaic_0001>

<bundles_post_ra>
// kernel: lstm_pos_tagger_forward.1
= control target key start
LH: loop header
LB: loop body
LE: loop exit
PB: predicated region body
PF: predicated region fallthrough
CT: control target
= control target key end

     0   :  { %vm37_vm0 = vcmask 130048   ;;  %v970_v8 = vmov 0.0   ;;  %s971_s13 = smov 64   ;;  %vm116_vm5 = vcmask 261120   ;;  %s1222_s1 = inlined_call_operand.vmem [shape: f32[16,128], index: 1, kind: input, shape index: {}]   ;;  %s1223_s0 = inlined_call_operand.vmem [shape: f32[64,16], index: 0, kind: input, shape index: {}]   ;;  %s1224_s2 = inlined_call_operand.vmem [shape: f32[32,128], index: 2, kind: input, shape index: {}]   ;;  %s1225_s3 = inlined_call_operand.vmem [shape: f32[1,128], index: 3, kind: input, shape index: {}]   ;;  %s1226_s4 = inlined_call_operand.vmem [shape: f32[32,128], index: 4, kind: input, shape index: {}]   ;;  %s1227_s5 = inlined_call_operand.vmem [shape: f32[1,128], index: 5, kind: input, shape index: {}]   ;;  %s1228_s6 = inlined_call_operand.vmem [shape: f32[64,128], index: 6, kind: output, shape index: {}]  }
   0x1   :  { %v32_v0 = vld [vmem:[%s1222_s1 + $0x8] sm:$0xff]  ;;  %v31_v1 = vld [vmem:[%s1222_s1] sm:$0xff]  ;;  %v30_v2 = vld [vmem:[%s1223_s0 + $0x38] sm:$0xff] }
   0x2   :  { %863 = vmatpush.msra.mxu2 %v32_v0  ;;  %v1020_v3 = vld [vmem:[%s1224_s2 + $0x18] sm:$0xff]  ;;  %76 = vmatpush.msra.mxu0 %v32_v0  ;;  %v23_v4 = vld [vmem:[%s1223_s0] sm:$0xff]  ;;  %v1031_v5 = vld [vmem:[%s1224_s2 + $0x10] sm:$0xff] }
   0x3   :  { %267 = vmatpush.msra.mxu3 %v1020_v3  ;;  %335 = vmatpush.msra.mxu1 %v1020_v3  ;;  %v1039_v6 = vld [vmem:[%s1224_s2 + $0x8] sm:$0xff]  ;;  %v1047_v7 = vld [vmem:[%s1224_s2] sm:$0xff] }
   0x4   :  { %864 = vmatpush.msra.mxu2 %v31_v1  ;;  %77 = vmatpush.msra.mxu0 %v31_v1  ;;  %v1075_v11 = vld [vmem:[%s1225_s3] ss:$0 sm:$0xff]  ;;  %s972_s3 = smov 32   ;;  %v24_v37 = vld [vmem:[%s1223_s0 + $0x8] sm:$0xff]  ;;  %v25_v1 = vld [vmem:[%s1223_s0 + $0x10] sm:$0xff] }
   0x5   :  { %839 = vmatmul.msk.f32.vlgmr.msra.gmra.mxu2 %vm37_vm0, %v30_v2  ;;  %832 = vmatmul.msk.f32.vlgmr.msra.gmra.mxu0 %vm37_vm0, %v23_v4 }
   0x6   :  { %132 = vmatpush.msrb.mxu2 %v1020_v3  ;;  %268 = vmatpush.msra.mxu3 %v1031_v5 }
   0x7   :  { %336 = vmatpush.msra.mxu1 %v1031_v5 }
   0x8   :  { %133 = vmatpush.msrb.mxu2 %v1031_v5  ;;  %269 = vmatpush.msra.mxu3 %v1039_v6 }
   0x9   :  { %337 = vmatpush.msra.mxu1 %v1039_v6 }
   0xa   :  { %134 = vmatpush.msrb.mxu2 %v1039_v6  ;;  %270 = vmatpush.msra.mxu3 %v1047_v7 }
   0xb   :  { %338 = vmatpush.msra.mxu1 %v1047_v7 }
   0xc   :  { %471 = vmatpush.msrb.mxu3 %v1020_v3  ;;  %135 = vmatpush.msrb.mxu2 %v1047_v7 }
   0xd   :  { %539 = vmatpush.msrb.mxu1 %v1020_v3  ;;  %136 = vmatmul.f32.vlgmr.msrb.gmra.mxu2 %v970_v8 }
   0xe   :  { %472 = vmatpush.msrb.mxu3 %v1031_v5  ;;  %199 = vmatpush.msra.mxu2 %v1020_v3 }
   0xf   :  { %540 = vmatpush.msrb.mxu1 %v1031_v5  ;;  %833 = vmatmul.msk.f32.gmra.mxu0 %vm37_vm0, %v24_v37 }
  0x10   :  { %473 = vmatpush.msrb.mxu3 %v1039_v6  ;;  %200 = vmatpush.msra.mxu2 %v1031_v5 }
  0x11   :  { %541 = vmatpush.msrb.mxu1 %v1039_v6 }
  0x12   :  { %474 = vmatpush.msrb.mxu3 %v1047_v7  ;;  %201 = vmatpush.msra.mxu2 %v1039_v6 }
  0x13   :  { %542 = vmatpush.msrb.mxu1 %v1047_v7 }
  0x14   :  { %202 = vmatpush.msra.mxu2 %v1047_v7 }
  0x16   :  { %403 = vmatpush.msrb.mxu2 %v1020_v3 }
  0x17   :  { %834 = vmatmul.msk.f32.gmra.mxu0 %vm37_vm0, %v25_v1 }
  0x18   :  { %404 = vmatpush.msrb.mxu2 %v1031_v5 }
  0x1a   :  { %405 = vmatpush.msrb.mxu2 %v1039_v6 }
  0x1c   :  { %406 = vmatpush.msrb.mxu2 %v1047_v7 }
  0x82   :  { %v79_v10 = vpop.f32.mrf.mxu0 }
  0x83   :  { %v80_v12 = vadd.f32 %v1075_v11, %v79_v10 }
  0x88   :  { %v1070_v9 = vpop.f32.mrf.mxu2 }
  0x8c   :  { %v82_v39 = vpop.f32.mrf.mxu0 }
  0x8d   :  { %v83_v40 = vadd.f32 %v1075_v11, %v82_v39 }
  0x90   :  { %v137_v13 = vpop.f32.mrf.mxu2 }
  0x91   :  { %v140_v14 = vadd.f32 %v137_v13, %v80_v12 }
  0x93   :  { %874 = vtanh.f32 %v140_v14  ;;  %v840_v16 = vmul.f32 -1.442695, %v140_v14 }
  0x95   :  { %876 = vpow2.f32 %v840_v16 }
  0x99   :  { %v875_v15 = vpop.eup %874 }
  0x9a   :  { %163 = vrot.lane.b32.xlu0 %v875_v15, %s971_s13 }
  0x9b   :  { %v877_v17 = vpop.eup %876 }
  0x9c   :  { %v144_v18 = vadd.f32 1.0, %v877_v17 }
  0x9e   :  { %878 = vrcp.f32 %v144_v18  ;;  %v156_v24 = vand.u32 2147483648, %v144_v18  ;;  %vm150_vm2 = vweird.f32 %v144_v18  ;;  %v154_v25 = vand.u32 2147483647, %v144_v18 }
  0xa0   :  { %v157_v27 = vor.u32 1.1754944e-38, %v156_v24  ;;  %vm155_vm4 = vcmp.eq.f32.partialorder %v154_v25, 8.507059e+37 }
  0xa4   :  { %v879_v19 = vpop.eup %878 }
  0xa5   :  { %v146_v20 = vmul.f32 %v879_v19, %v144_v18  ;;  %vm151_vm1 = vweird.f32 %v879_v19 }
  0xa6   :  { %vm152_vm3 = vmor %vm150_vm2, %vm151_vm1 }
  0xa7   :  { %v147_v21 = vsub.f32 1.0, %v146_v20 }
  0xa9   :  { %v148_v22 = vmul.f32 %v879_v19, %v147_v21 }
  0xab   :  { %v149_v23 = vadd.f32 %v879_v19, %v148_v22 }
  0xad   :  { %v153_v26 = vsel %vm152_vm3, %v879_v19, %v149_v23 }
  0xae   :  { %v158_v29 = vsel %vm155_vm4, %v157_v27, %v153_v26 }
  0xaf   :  { %v161_v31 = vmul.f32 0.0, %v158_v29 }
 0x10c   :  { %v164_v28 = vpop.permute.xlu0 %163 }
 0x10d   :  { %v166_v30 = vmul.f32 %v164_v28, %v158_v29 }
 0x10f   :  { %168 = vrot.lane.b32.xlu0 %v166_v30, %s972_s3 }
 0x181   :  { %v169_v32 = vpop.permute.xlu0 %168 }
 0x182   :  { %v171_v33 = vadd.f32 %v169_v32, %v161_v31 }
 0x184   :  { %880 = vtanh.f32 %v171_v33 }
 0x18a   :  { %v881_v34 = vpop.eup %880 }
 0x18b   :  { %174 = vrot.lane.b32.xlu1 %v881_v34, %s971_s13 }
 0x1fd   :  { %v175_v35 = vpop.permute.xlu1 %174 }
 0x1fe   :  { %v177_v36 = vmul.f32 %v175_v35, %v158_v29  ;;  %v26_v29 = vld [vmem:[%s1223_s0 + $0x18] sm:$0xff] }
 0x1ff   :  { %835 = vmatmul.msk.f32.gmra.mxu0 %vm37_vm0, %v26_v29  ;;  %v667_v29 = vld [vmem:[%s1226_s4] sm:$0xff] }
 0x200   :  { %179 = vrot.lane.b32.xlu1 %v177_v36, %s972_s3 }
 0x272   :  { %v180_v38 = vpop.permute.xlu1 %179 }
 0x273   :  { %182 = vst.msk [vmem:[#allocation3] sm:$0xff] %vm116_vm5, %v180_v38  ;;  %841 = vmatmul.msk.f32.vlgmr.msra.gmra.mxu2 %vm116_vm5, %v180_v38 }
 0x274   :  { %607 = vmatpush.msra.mxu2 %v1020_v3  ;;  %v85_v3 = vpop.f32.mrf.mxu0 }
 0x275   :  { %v86_v4 = vadd.f32 %v1075_v11, %v85_v3 }
 0x276   :  { %608 = vmatpush.msra.mxu2 %v1031_v5 }
 0x278   :  { %609 = vmatpush.msra.mxu2 %v1039_v6 }
 0x27a   :  { %610 = vmatpush.msra.mxu2 %v1047_v7 }
 0x2f6   :  { %v204_v41 = vpop.f32.mrf.mxu2 }
 0x2f7   :  { %v207_v42 = vadd.f32 %v204_v41, %v83_v40 }
 0x2f9   :  { %882 = vtanh.f32 %v207_v42  ;;  %v842_v44 = vmul.f32 -1.442695, %v207_v42 }
 0x2fb   :  { %884 = vpow2.f32 %v842_v44 }
 0x2ff   :  { %v883_v43 = vpop.eup %882 }
 0x300   :  { %230 = vrot.lane.b32.xlu2 %v883_v43, %s971_s13 }
 0x301   :  { %v885_v45 = vpop.eup %884 }
 0x302   :  { %v211_v46 = vadd.f32 1.0, %v885_v45 }
 0x304   :  { %886 = vrcp.f32 %v211_v46  ;;  %v223_v52 = vand.u32 2147483648, %v211_v46  ;;  %vm217_vm7 = vweird.f32 %v211_v46  ;;  %v221_v53 = vand.u32 2147483647, %v211_v46 }
 0x306   :  { %v224_v55 = vor.u32 1.1754944e-38, %v223_v52  ;;  %vm222_vm9 = vcmp.eq.f32.partialorder %v221_v53, 8.507059e+37 }
 0x30a   :  { %v887_v47 = vpop.eup %886 }
 0x30b   :  { %v213_v48 = vmul.f32 %v887_v47, %v211_v46  ;;  %vm218_vm6 = vweird.f32 %v887_v47 }
 0x30c   :  { %vm219_vm8 = vmor %vm217_vm7, %vm218_vm6 }
 0x30d   :  { %v214_v49 = vsub.f32 1.0, %v213_v48 }
 0x30f   :  { %v215_v50 = vmul.f32 %v887_v47, %v214_v49 }
 0x311   :  { %v216_v51 = vadd.f32 %v887_v47, %v215_v50 }
 0x313   :  { %v220_v54 = vsel %vm219_vm8, %v887_v47, %v216_v51 }
 0x314   :  { %v225_v57 = vsel %vm222_vm9, %v224_v55, %v220_v54 }
 0x315   :  { %v228_v59 = vmul.f32 %v225_v57, %v171_v33  ;;  %v88_v33 = vpop.f32.mrf.mxu0 }
 0x316   :  { %v89_v34 = vadd.f32 %v1075_v11, %v88_v33 }
 0x35a   :  { %v231_v56 = vpop.permute.xlu2 %230 }
 0x35b   :  { %v233_v58 = vmul.f32 %v231_v56, %v225_v57 }
 0x35d   :  { %235 = vrot.lane.b32.xlu2 %v233_v58, %s972_s3 }
 0x3b7   :  { %v236_v60 = vpop.permute.xlu2 %235 }
 0x3b8   :  { %v238_v61 = vadd.f32 %v236_v60, %v228_v59  ;;  %v27_v59 = vld [vmem:[%s1223_s0 + $0x20] sm:$0xff] }
 0x3b9   :  { %836 = vmatmul.msk.f32.gmra.mxu0 %vm37_vm0, %v27_v59 }
 0x3ba   :  { %888 = vtanh.f32 %v238_v61 }
 0x3c0   :  { %v889_v62 = vpop.eup %888 }
 0x3c1   :  { %241 = vrot.lane.b32.xlu0 %v889_v62, %s971_s13 }
 0x433   :  { %v242_v63 = vpop.permute.xlu0 %241 }
 0x434   :  { %v244_v0 = vmul.f32 %v242_v63, %v225_v57 }
 0x436   :  { %246 = vrot.lane.b32.xlu1 %v244_v0, %s972_s3 }
 0x4a8   :  { %v247_v2 = vpop.permute.xlu1 %246 }
 0x4a9   :  { %250 = vst.msk [vmem:[#allocation3 + $0x8] sm:$0xff] %vm116_vm5, %v247_v2  ;;  %843 = vmatmul.msk.f32.vlgmr.msra.gmra.mxu3 %vm116_vm5, %v247_v2 }
 0x52c   :  { %v272_v5 = vpop.f32.mrf.mxu3 }
 0x52d   :  { %v275_v6 = vadd.f32 %v272_v5, %v86_v4 }
 0x52f   :  { %890 = vtanh.f32 %v275_v6  ;;  %v844_v8 = vmul.f32 -1.442695, %v275_v6 }
 0x531   :  { %892 = vpow2.f32 %v844_v8 }
 0x535   :  { %v891_v7 = vpop.eup %890 }
 0x536   :  { %298 = vrot.lane.b32.xlu2 %v891_v7, %s971_s13 }
 0x537   :  { %v893_v10 = vpop.eup %892 }
 0x538   :  { %v279_v12 = vadd.f32 1.0, %v893_v10 }
 0x53a   :  { %894 = vrcp.f32 %v279_v12  ;;  %v291_v18 = vand.u32 2147483648, %v279_v12  ;;  %vm285_vm11 = vweird.f32 %v279_v12  ;;  %v289_v19 = vand.u32 2147483647, %v279_v12 }
 0x53c   :  { %v292_v21 = vor.u32 1.1754944e-38, %v291_v18  ;;  %vm290_vm13 = vcmp.eq.f32.partialorder %v289_v19, 8.507059e+37 }
 0x540   :  { %v895_v13 = vpop.eup %894 }
 0x541   :  { %v281_v14 = vmul.f32 %v895_v13, %v279_v12  ;;  %vm286_vm10 = vweird.f32 %v895_v13 }
 0x542   :  { %vm287_vm12 = vmor %vm285_vm11, %vm286_vm10 }
 0x543   :  { %v282_v15 = vsub.f32 1.0, %v281_v14 }
 0x545   :  { %v283_v16 = vmul.f32 %v895_v13, %v282_v15 }
 0x547   :  { %v284_v17 = vadd.f32 %v895_v13, %v283_v16 }
 0x549   :  { %v288_v20 = vsel %vm287_vm12, %v895_v13, %v284_v17 }
 0x54a   :  { %v293_v23 = vsel %vm290_vm13, %v292_v21, %v288_v20 }
 0x54b   :  { %v296_v25 = vmul.f32 %v293_v23, %v238_v61  ;;  %v91_v61 = vpop.f32.mrf.mxu0 }
 0x54c   :  { %v92_v62 = vadd.f32 %v1075_v11, %v91_v61 }
 0x590   :  { %v299_v22 = vpop.permute.xlu2 %298 }
 0x591   :  { %v301_v24 = vmul.f32 %v299_v22, %v293_v23 }
 0x593   :  { %303 = vrot.lane.b32.xlu0 %v301_v24, %s972_s3 }
 0x605   :  { %v304_v26 = vpop.permute.xlu0 %303 }
 0x606   :  { %v306_v27 = vadd.f32 %v304_v26, %v296_v25  ;;  %v670_v25 = vld [vmem:[%s1226_s4 + $0x18] sm:$0xff]  ;;  %v669_v26 = vld [vmem:[%s1226_s4 + $0x10] sm:$0xff] }
 0x607   :  { %865 = vmatpush.msra.mxu3 %v670_v25 }
 0x608   :  { %896 = vtanh.f32 %v306_v27 }
 0x609   :  { %866 = vmatpush.msra.mxu3 %v669_v26 }
 0x60e   :  { %v897_v28 = vpop.eup %896 }
 0x60f   :  { %309 = vrot.lane.b32.xlu1 %v897_v28, %s971_s13  ;;  %v668_v28 = vld [vmem:[%s1226_s4 + $0x8] sm:$0xff] }
 0x610   :  { %867 = vmatpush.msra.mxu3 %v668_v28 }
 0x612   :  { %868 = vmatpush.msra.mxu3 %v667_v29 }
 0x681   :  { %v310_v30 = vpop.permute.xlu1 %309 }
 0x682   :  { %v312_v31 = vmul.f32 %v310_v30, %v293_v23 }
 0x684   :  { %314 = vrot.lane.b32.xlu2 %v312_v31, %s972_s3 }
 0x6de   :  { %v315_v32 = vpop.permute.xlu2 %314 }
 0x6df   :  { %318 = vst.msk [vmem:[#allocation3 + $0x10] sm:$0xff] %vm116_vm5, %v315_v32  ;;  %845 = vmatmul.msk.f32.vlgmr.msra.gmra.mxu1 %vm116_vm5, %v315_v32 }
 0x6e0   :  { %711 = vmatpush.msra.mxu1 %v670_v25 }
 0x6e2   :  { %712 = vmatpush.msra.mxu1 %v669_v26 }
 0x6e4   :  { %713 = vmatpush.msra.mxu1 %v668_v28 }
 0x6e6   :  { %714 = vmatpush.msra.mxu1 %v667_v29 }
 0x75c   :  { %v340_v35 = vpop.f32.mrf.mxu1 }
 0x75d   :  { %v343_v36 = vadd.f32 %v340_v35, %v89_v34 }
 0x75f   :  { %898 = vtanh.f32 %v343_v36  ;;  %v846_v38 = vmul.f32 -1.442695, %v343_v36 }
 0x761   :  { %900 = vpow2.f32 %v846_v38 }
 0x765   :  { %v899_v37 = vpop.eup %898 }
 0x766   :  { %366 = vrot.lane.b32.xlu0 %v899_v37, %s971_s13 }
 0x767   :  { %v901_v39 = vpop.eup %900 }
 0x768   :  { %v347_v40 = vadd.f32 1.0, %v901_v39 }
 0x76a   :  { %902 = vrcp.f32 %v347_v40  ;;  %v359_v46 = vand.u32 2147483648, %v347_v40  ;;  %vm353_vm15 = vweird.f32 %v347_v40  ;;  %v357_v47 = vand.u32 2147483647, %v347_v40 }
 0x76c   :  { %v360_v49 = vor.u32 1.1754944e-38, %v359_v46  ;;  %vm358_vm2 = vcmp.eq.f32.partialorder %v357_v47, 8.507059e+37 }
 0x770   :  { %v903_v41 = vpop.eup %902 }
 0x771   :  { %v349_v42 = vmul.f32 %v903_v41, %v347_v40  ;;  %vm354_vm14 = vweird.f32 %v903_v41 }
 0x772   :  { %vm355_vm1 = vmor %vm353_vm15, %vm354_vm14 }
 0x773   :  { %v350_v43 = vsub.f32 1.0, %v349_v42 }
 0x775   :  { %v351_v44 = vmul.f32 %v903_v41, %v350_v43 }
 0x777   :  { %v352_v45 = vadd.f32 %v903_v41, %v351_v44 }
 0x779   :  { %v356_v48 = vsel %vm355_vm1, %v903_v41, %v352_v45 }
 0x77a   :  { %v361_v51 = vsel %vm358_vm2, %v360_v49, %v356_v48 }
 0x77b   :  { %v364_v53 = vmul.f32 %v361_v51, %v306_v27  ;;  %v28_v27 = vld [vmem:[%s1223_s0 + $0x28] sm:$0xff] }
 0x77c   :  { %837 = vmatmul.msk.f32.gmra.mxu0 %vm37_vm0, %v28_v27 }
 0x7d8   :  { %v367_v50 = vpop.permute.xlu0 %366 }
 0x7d9   :  { %v369_v52 = vmul.f32 %v367_v50, %v361_v51 }
 0x7db   :  { %371 = vrot.lane.b32.xlu1 %v369_v52, %s972_s3 }
 0x7f9   :  { %v94_v32 = vpop.f32.mrf.mxu0 }
 0x7fa   :  { %v95_v33 = vadd.f32 %v1075_v11, %v94_v32 }
 0x84d   :  { %v372_v54 = vpop.permute.xlu1 %371 }
 0x84e   :  { %v374_v55 = vadd.f32 %v372_v54, %v364_v53 }
 0x850   :  { %904 = vtanh.f32 %v374_v55 }
 0x856   :  { %v905_v56 = vpop.eup %904 }
 0x857   :  { %377 = vrot.lane.b32.xlu2 %v905_v56, %s971_s13  ;;  %v29_v56 = vld [vmem:[%s1223_s0 + $0x30] sm:$0xff] }
 0x858   :  { %838 = vmatmul.msk.f32.gmra.mxu0 %vm37_vm0, %v29_v56 }
 0x8b1   :  { %v378_v57 = vpop.permute.xlu2 %377 }
 0x8b2   :  { %v380_v58 = vmul.f32 %v378_v57, %v361_v51 }
 0x8b4   :  { %382 = vrot.lane.b32.xlu0 %v380_v58, %s972_s3 }
 0x926   :  { %v383_v60 = vpop.permute.xlu0 %382 }
 0x927   :  { %386 = vst.msk [vmem:[#allocation3 + $0x18] sm:$0xff] %vm116_vm5, %v383_v60  ;;  %847 = vmatmul.msk.f32.vlgmr.msrb.gmra.mxu2 %vm116_vm5, %v383_v60  ;;  %v659_v60 = vld [vmem:[#allocation3] sm:$0xff] }
 0x9aa   :  { %v408_v63 = vpop.f32.mrf.mxu2 }
 0x9ab   :  { %v411_v0 = vadd.f32 %v408_v63, %v92_v62  ;;  %v660_v62 = vld [vmem:[#allocation3 + $0x8] sm:$0xff]  ;;  %v661_v63 = vld [vmem:[#allocation3 + $0x10] sm:$0xff] }
 0x9ad   :  { %906 = vtanh.f32 %v411_v0  ;;  %v848_v2 = vmul.f32 -1.442695, %v411_v0  ;;  %v662_v0 = vld [vmem:[#allocation3 + $0x18] sm:$0xff] }
 0x9af   :  { %908 = vpow2.f32 %v848_v2 }
 0x9b3   :  { %v907_v1 = vpop.eup %906 }
 0x9b4   :  { %434 = vrot.lane.b32.xlu1 %v907_v1, %s971_s13  ;;  %v97_v1 = vpop.f32.mrf.mxu0 }
 0x9b5   :  { %v909_v3 = vpop.eup %908  ;;  %v98_v2 = vadd.f32 %v1075_v11, %v97_v1 }
 0x9b6   :  { %v415_v4 = vadd.f32 1.0, %v909_v3 }
 0x9b8   :  { %910 = vrcp.f32 %v415_v4  ;;  %v427_v12 = vand.u32 2147483648, %v415_v4  ;;  %vm421_vm4 = vweird.f32 %v415_v4  ;;  %v425_v13 = vand.u32 2147483647, %v415_v4 }
 0x9ba   :  { %v428_v15 = vor.u32 1.1754944e-38, %v427_v12  ;;  %vm426_vm7 = vcmp.eq.f32.partialorder %v425_v13, 8.507059e+37 }
 0x9be   :  { %v911_v5 = vpop.eup %910 }
 0x9bf   :  { %v417_v6 = vmul.f32 %v911_v5, %v415_v4  ;;  %vm422_vm3 = vweird.f32 %v911_v5 }
 0x9c0   :  { %vm423_vm6 = vmor %vm421_vm4, %vm422_vm3 }
 0x9c1   :  { %v418_v7 = vsub.f32 1.0, %v417_v6 }
 0x9c3   :  { %v419_v8 = vmul.f32 %v911_v5, %v418_v7 }
 0x9c5   :  { %v420_v10 = vadd.f32 %v911_v5, %v419_v8 }
 0x9c7   :  { %v424_v14 = vsel %vm423_vm6, %v911_v5, %v420_v10 }
 0x9c8   :  { %v429_v17 = vsel %vm426_vm7, %v428_v15, %v424_v14 }
 0x9c9   :  { %v432_v19 = vmul.f32 %v429_v17, %v374_v55 }
 0xa26   :  { %v435_v16 = vpop.permute.xlu1 %434 }
 0xa27   :  { %v437_v18 = vmul.f32 %v435_v16, %v429_v17 }
 0xa29   :  { %439 = vrot.lane.b32.xlu2 %v437_v18, %s972_s3 }
 0xa83   :  { %v440_v20 = vpop.permute.xlu2 %439 }
 0xa84   :  { %v442_v21 = vadd.f32 %v440_v20, %v432_v19 }
 0xa86   :  { %912 = vtanh.f32 %v442_v21 }
 0xa8c   :  { %v913_v22 = vpop.eup %912 }
 0xa8d   :  { %445 = vrot.lane.b32.xlu0 %v913_v22, %s971_s13 }
 0xaff   :  { %v446_v23 = vpop.permute.xlu0 %445 }
 0xb00   :  { %v448_v24 = vmul.f32 %v446_v23, %v429_v17 }
 0xb02   :  { %450 = vrot.lane.b32.xlu1 %v448_v24, %s972_s3 }
 0xb74   :  { %v451_v30 = vpop.permute.xlu1 %450 }
 0xb75   :  { %454 = vst.msk [vmem:[#allocation3 + $0x20] sm:$0xff] %vm116_vm5, %v451_v30  ;;  %849 = vmatmul.msk.f32.vlgmr.msrb.gmra.mxu3 %vm116_vm5, %v451_v30 }
 0xb7c   :  { %v663_v31 = vld [vmem:[#allocation3 + $0x20] sm:$0xff] }
 0xb7d   :  { %859 = vmatmul.msk.f32.vlgmr.msra.gmra.mxu3 %vm116_vm5, %v663_v31  ;;  %v101_v31 = vadd.f32 %v1075_v11, %v1070_v9 }
 0xbf8   :  { %v476_v34 = vpop.f32.mrf.mxu3 }
 0xbf9   :  { %v479_v35 = vadd.f32 %v476_v34, %v95_v33 }
 0xbfb   :  { %914 = vtanh.f32 %v479_v35  ;;  %v850_v37 = vmul.f32 -1.442695, %v479_v35 }
 0xbfd   :  { %916 = vpow2.f32 %v850_v37 }
 0xc01   :  { %v915_v36 = vpop.eup %914 }
 0xc02   :  { %502 = vrot.lane.b32.xlu2 %v915_v36, %s971_s13 }
 0xc03   :  { %v917_v38 = vpop.eup %916 }
 0xc04   :  { %v483_v39 = vadd.f32 1.0, %v917_v38 }
 0xc06   :  { %918 = vrcp.f32 %v483_v39  ;;  %v495_v45 = vand.u32 2147483648, %v483_v39  ;;  %vm489_vm9 = vweird.f32 %v483_v39  ;;  %v493_v46 = vand.u32 2147483647, %v483_v39 }
 0xc08   :  { %v496_v48 = vor.u32 1.1754944e-38, %v495_v45  ;;  %vm494_vm11 = vcmp.eq.f32.partialorder %v493_v46, 8.507059e+37 }
 0xc0c   :  { %v919_v40 = vpop.eup %918 }
 0xc0d   :  { %v485_v41 = vmul.f32 %v919_v40, %v483_v39  ;;  %vm490_vm8 = vweird.f32 %v919_v40 }
 0xc0e   :  { %vm491_vm10 = vmor %vm489_vm9, %vm490_vm8 }
 0xc0f   :  { %v486_v42 = vsub.f32 1.0, %v485_v41 }
 0xc11   :  { %v487_v43 = vmul.f32 %v919_v40, %v486_v42 }
 0xc13   :  { %v488_v44 = vadd.f32 %v919_v40, %v487_v43 }
 0xc15   :  { %v492_v47 = vsel %vm491_vm10, %v919_v40, %v488_v44 }
 0xc16   :  { %v497_v50 = vsel %vm494_vm11, %v496_v48, %v492_v47 }
 0xc17   :  { %v500_v52 = vmul.f32 %v497_v50, %v442_v21 }
 0xc5c   :  { %v503_v49 = vpop.permute.xlu2 %502 }
 0xc5d   :  { %v505_v51 = vmul.f32 %v503_v49, %v497_v50 }
 0xc5f   :  { %507 = vrot.lane.b32.xlu0 %v505_v51, %s972_s3  ;;  %v1180_v51 = vld [vmem:[%s1227_s5] ss:$0 sm:$0xff] }
 0xcd1   :  { %v508_v53 = vpop.permute.xlu0 %507 }
 0xcd2   :  { %v510_v54 = vadd.f32 %v508_v53, %v500_v52 }
 0xcd4   :  { %920 = vtanh.f32 %v510_v54 }
 0xcda   :  { %v921_v55 = vpop.eup %920 }
 0xcdb   :  { %513 = vrot.lane.b32.xlu1 %v921_v55, %s971_s13  ;;  %v728_v55 = vpop.f32.mrf.mxu3 }
 0xcdc   :  { %v729_v56 = vadd.f32 %v1180_v51, %v728_v55 }
 0xd4d   :  { %v514_v57 = vpop.permute.xlu1 %513 }
 0xd4e   :  { %v516_v58 = vmul.f32 %v514_v57, %v497_v50 }
 0xd50   :  { %518 = vrot.lane.b32.xlu2 %v516_v58, %s972_s3 }
 0xdaa   :  { %v519_v59 = vpop.permute.xlu2 %518 }
 0xdab   :  { %522 = vst.msk [vmem:[#allocation3 + $0x28] sm:$0xff] %vm116_vm5, %v519_v59  ;;  %851 = vmatmul.msk.f32.vlgmr.msrb.gmra.mxu1 %vm116_vm5, %v519_v59 }
 0xdb2   :  { %v664_v61 = vld [vmem:[#allocation3 + $0x28] sm:$0xff] }
 0xdb3   :  { %855 = vmatmul.msk.f32.vlgmr.msra.gmra.mxu1 %vm116_vm5, %v659_v60  ;;  %860 = vmatmul.msk.f32.gmra.mxu3 %vm116_vm5, %v664_v61 }
 0xdbb   :  { %856 = vmatmul.msk.f32.gmra.mxu1 %vm116_vm5, %v660_v62 }
 0xdc3   :  { %857 = vmatmul.msk.f32.gmra.mxu1 %vm116_vm5, %v661_v63 }
 0xdcb   :  { %858 = vmatmul.msk.f32.gmra.mxu1 %vm116_vm5, %v662_v0 }
 0xe28   :  { %v544_v3 = vpop.f32.mrf.mxu1 }
 0xe29   :  { %v547_v4 = vadd.f32 %v544_v3, %v98_v2 }
 0xe2b   :  { %922 = vtanh.f32 %v547_v4  ;;  %v852_v6 = vmul.f32 -1.442695, %v547_v4 }
 0xe2d   :  { %924 = vpow2.f32 %v852_v6 }
 0xe30   :  { %v716_v48 = vpop.f32.mrf.mxu1 }
 0xe31   :  { %v923_v5 = vpop.eup %922  ;;  %v717_v52 = vadd.f32 %v1180_v51, %v716_v48 }
 0xe32   :  { %570 = vrot.lane.b32.xlu0 %v923_v5, %s971_s13 }
 0xe33   :  { %v925_v7 = vpop.eup %924 }
 0xe34   :  { %v551_v8 = vadd.f32 1.0, %v925_v7 }
 0xe36   :  { %926 = vrcp.f32 %v551_v8  ;;  %v563_v16 = vand.u32 2147483648, %v551_v8  ;;  %vm557_vm12 = vweird.f32 %v551_v8  ;;  %v561_v17 = vand.u32 2147483647, %v551_v8  ;;  %v731_v62 = vpop.f32.mrf.mxu3 }
 0xe37   :  { %v1188_v63 = vadd.f32 %v1180_v51, %v731_v62 }
 0xe38   :  { %v564_v19 = vor.u32 1.1754944e-38, %v563_v16  ;;  %vm562_vm14 = vcmp.eq.f32.partialorder %v561_v17, 8.507059e+37  ;;  %v719_v49 = vpop.f32.mrf.mxu1 }
 0xe39   :  { %v720_v61 = vadd.f32 %v1180_v51, %v719_v49 }
 0xe3c   :  { %v927_v10 = vpop.eup %926 }
 0xe3d   :  { %v553_v12 = vmul.f32 %v927_v10, %v551_v8  ;;  %vm558_vm0 = vweird.f32 %v927_v10 }
 0xe3e   :  { %vm559_vm13 = vmor %vm557_vm12, %vm558_vm0 }
 0xe3f   :  { %v554_v13 = vsub.f32 1.0, %v553_v12 }
 0xe40   :  { %v722_v50 = vpop.f32.mrf.mxu1 }
 0xe41   :  { %v555_v14 = vmul.f32 %v927_v10, %v554_v13  ;;  %v723_v12 = vadd.f32 %v1180_v51, %v722_v50 }
 0xe43   :  { %v556_v15 = vadd.f32 %v927_v10, %v555_v14 }
 0xe45   :  { %v560_v18 = vsel %vm559_vm13, %v927_v10, %v556_v15 }
 0xe46   :  { %v565_v21 = vsel %vm562_vm14, %v564_v19, %v560_v18 }
 0xe47   :  { %v568_v23 = vmul.f32 %v565_v21, %v510_v54 }
 0xe48   :  { %v725_v53 = vpop.f32.mrf.mxu1 }
 0xe49   :  { %v726_v54 = vadd.f32 %v1180_v51, %v725_v53 }
 0xea4   :  { %v571_v20 = vpop.permute.xlu0 %570 }
 0xea5   :  { %v573_v22 = vmul.f32 %v571_v20, %v565_v21 }
 0xea7   :  { %575 = vrot.lane.b32.xlu1 %v573_v22, %s972_s3 }
 0xf19   :  { %v576_v24 = vpop.permute.xlu1 %575 }
 0xf1a   :  { %v578_v25 = vadd.f32 %v576_v24, %v568_v23 }
 0xf1c   :  { %928 = vtanh.f32 %v578_v25 }
 0xf22   :  { %v929_v26 = vpop.eup %928 }
 0xf23   :  { %581 = vrot.lane.b32.xlu2 %v929_v26, %s971_s13 }
 0xf7d   :  { %v582_v27 = vpop.permute.xlu2 %581 }
 0xf7e   :  { %v584_v28 = vmul.f32 %v582_v27, %v565_v21 }
 0xf80   :  { %586 = vrot.lane.b32.xlu0 %v584_v28, %s972_s3 }
 0xff2   :  { %v587_v29 = vpop.permute.xlu0 %586 }
 0xff3   :  { %590 = vst.msk [vmem:[#allocation3 + $0x30] sm:$0xff] %vm116_vm5, %v587_v29  ;;  %853 = vmatmul.msk.f32.vlgmr.msra.gmra.mxu2 %vm116_vm5, %v587_v29 }
 0xffa   :  { %v665_v30 = vld [vmem:[#allocation3 + $0x30] sm:$0xff] }
 0xffb   :  { %861 = vmatmul.msk.f32.gmra.mxu3 %vm116_vm5, %v665_v30 }
0x1076   :  { %v612_v32 = vpop.f32.mrf.mxu2 }
0x1077   :  { %v615_v33 = vadd.f32 %v612_v32, %v101_v31 }
0x1079   :  { %930 = vtanh.f32 %v615_v33  ;;  %v854_v35 = vmul.f32 -1.442695, %v615_v33 }
0x107b   :  { %932 = vpow2.f32 %v854_v35 }
0x107e   :  { %v734_v15 = vpop.f32.mrf.mxu3 }
0x107f   :  { %v931_v34 = vpop.eup %930  ;;  %v735_v17 = vadd.f32 %v1180_v51, %v734_v15 }
0x1080   :  { %638 = vrot.lane.b32.xlu1 %v931_v34, %s971_s13 }
0x1081   :  { %v933_v36 = vpop.eup %932 }
0x1082   :  { %v619_v37 = vadd.f32 1.0, %v933_v36 }
0x1084   :  { %934 = vrcp.f32 %v619_v37  ;;  %v631_v43 = vand.u32 2147483648, %v619_v37  ;;  %vm625_vm1 = vweird.f32 %v619_v37  ;;  %v629_v9 = vand.u32 2147483647, %v619_v37 }
0x1086   :  { %v632_v44 = vor.u32 1.1754944e-38, %v631_v43  ;;  %vm630_vm3 = vcmp.eq.f32.partialorder %v629_v9, 8.507059e+37 }
0x108a   :  { %v935_v38 = vpop.eup %934 }
0x108b   :  { %v621_v39 = vmul.f32 %v935_v38, %v619_v37  ;;  %vm626_vm15 = vweird.f32 %v935_v38 }
0x108c   :  { %vm627_vm2 = vmor %vm625_vm1, %vm626_vm15 }
0x108d   :  { %v622_v40 = vsub.f32 1.0, %v621_v39 }
0x108f   :  { %v623_v41 = vmul.f32 %v935_v38, %v622_v40 }
0x1091   :  { %v624_v42 = vadd.f32 %v935_v38, %v623_v41 }
0x1093   :  { %v628_v11 = vsel %vm627_vm2, %v935_v38, %v624_v42 }
0x1094   :  { %v633_v46 = vsel %vm630_vm3, %v632_v44, %v628_v11 }
0x1095   :  { %v636_v57 = vmul.f32 %v633_v46, %v578_v25 }
0x10f2   :  { %v639_v45 = vpop.permute.xlu1 %638 }
0x10f3   :  { %v641_v47 = vmul.f32 %v639_v45, %v633_v46 }
0x10f5   :  { %643 = vrot.lane.b32.xlu2 %v641_v47, %s972_s3 }
0x111e   :  { %740 = vmax.xlane.f32.xlu2 %v717_v52 }
0x1126   :  { %746 = vmax.xlane.f32.xlu2 %v726_v54 }
0x112e   :  { %748 = vmax.xlane.f32.xlu2 %v729_v56 }
0x114f   :  { %v644_v58 = vpop.permute.xlu2 %643 }
0x1150   :  { %v646_v59 = vadd.f32 %v644_v58, %v636_v57 }
0x1152   :  { %936 = vtanh.f32 %v646_v59 }
0x1158   :  { %v937_v60 = vpop.eup %936 }
0x1159   :  { %649 = vrot.lane.b32.xlu0 %v937_v60, %s971_s13 }
0x1183   :  { %742 = vmax.xlane.f32.xlu0 %v720_v61 }
0x118b   :  { %750 = vmax.xlane.f32.xlu0 %v1188_v63 }
0x1191   :  { %v741_v0 = vpop.xlane.xlu2 %740 }
0x1192   :  { %v756_v1 = vsub.f32 %v717_v52, %v741_v0 }
0x1194   :  { %v764_v2 = vmul.f32 1.442695, %v756_v1 }
0x1196   :  { %938 = vpow2.f32 %v764_v2 }
0x1199   :  { %v747_v3 = vpop.xlane.xlu2 %746 }
0x119a   :  { %v759_v4 = vsub.f32 %v726_v54, %v747_v3 }
0x119c   :  { %v939_v5 = vpop.eup %938  ;;  %v770_v6 = vmul.f32 1.442695, %v759_v4 }
0x119d   :  { %780 = vadd.xlane.f32.xlu0 %v939_v5 }
0x119e   :  { %940 = vpow2.f32 %v770_v6 }
0x11a1   :  { %v749_v18 = vpop.xlane.xlu2 %748 }
0x11a2   :  { %v760_v19 = vsub.f32 %v729_v56, %v749_v18 }
0x11a4   :  { %v941_v7 = vpop.eup %940  ;;  %v772_v20 = vmul.f32 1.442695, %v760_v19 }
0x11a5   :  { %786 = vadd.xlane.f32.xlu0 %v941_v7 }
0x11cb   :  { %v650_v8 = vpop.permute.xlu0 %649 }
0x11cc   :  { %v652_v10 = vmul.f32 %v650_v8, %v633_v46 }
0x11ce   :  { %654 = vrot.lane.b32.xlu1 %v652_v10, %s972_s3 }
0x11f6   :  { %v743_v13 = vpop.xlane.xlu0 %742 }
0x11f7   :  { %v757_v14 = vsub.f32 %v720_v61, %v743_v13 }
0x11f8   :  { %744 = vmax.xlane.f32.xlu1 %v723_v12 }
0x11f9   :  { %v766_v16 = vmul.f32 1.442695, %v757_v14 }
0x11fb   :  { %942 = vpow2.f32 %v766_v16 }
0x11fc   :  { %944 = vpow2.f32 %v772_v20 }
0x11fe   :  { %v751_v22 = vpop.xlane.xlu0 %750 }
0x11ff   :  { %v761_v49 = vsub.f32 %v1188_v63, %v751_v22 }
0x1200   :  { %752 = vmax.xlane.f32.xlu1 %v735_v17 }
0x1201   :  { %v943_v21 = vpop.eup %942  ;;  %v774_v50 = vmul.f32 1.442695, %v761_v49 }
0x1202   :  { %v945_v23 = vpop.eup %944 }
0x1208   :  { %782 = vadd.xlane.f32.xlu1 %v943_v21 }
0x1210   :  { %v781_v24 = vpop.xlane.xlu0 %780  ;;  %788 = vadd.xlane.f32.xlu1 %v945_v23 }
0x1211   :  { %946 = vlog2.f32 %v781_v24 }
0x1217   :  { %v947_v25 = vpop.eup %946 }
0x1218   :  { %v797_v26 = vmul.f32 0.6931472, %v947_v25  ;;  %v787_v27 = vpop.xlane.xlu0 %786 }
0x1219   :  { %948 = vlog2.f32 %v787_v27 }
0x121a   :  { %v812_v28 = vsub.f32 %v756_v1, %v797_v26 }
0x121c   :  { %820 = vst [vmem:[%s1228_s6] sm:$0xff] %v812_v28 }
0x121f   :  { %v949_v29 = vpop.eup %948 }
0x1220   :  { %v803_v30 = vmul.f32 0.6931472, %v949_v29 }
0x1222   :  { %v815_v31 = vsub.f32 %v759_v4, %v803_v30 }
0x1224   :  { %823 = vst [vmem:[%s1228_s6 + $0x18] sm:$0xff] %v815_v31 }
0x1240   :  { %v655_v32 = vpop.permute.xlu1 %654 }
0x1241   :  { %658 = vst.msk [vmem:[#allocation3 + $0x38] sm:$0xff] %vm116_vm5, %v655_v32 }
0x1248   :  { %v666_v33 = vld [vmem:[#allocation3 + $0x38] sm:$0xff] }
0x1249   :  { %862 = vmatmul.msk.f32.gmra.mxu3 %vm116_vm5, %v666_v33 }
0x126b   :  { %v745_v34 = vpop.xlane.xlu1 %744 }
0x126c   :  { %v758_v45 = vsub.f32 %v723_v12, %v745_v34 }
0x126e   :  { %v768_v46 = vmul.f32 1.442695, %v758_v45 }
0x1273   :  { %v753_v35 = vpop.xlane.xlu1 %752 }
0x1274   :  { %v762_v36 = vsub.f32 %v735_v17, %v753_v35 }
0x1276   :  { %v776_v37 = vmul.f32 1.442695, %v762_v36 }
0x1278   :  { %950 = vpow2.f32 %v776_v37 }
0x127b   :  { %v783_v38 = vpop.xlane.xlu1 %782 }
0x127c   :  { %952 = vlog2.f32 %v783_v38 }
0x127e   :  { %v951_v39 = vpop.eup %950 }
0x127f   :  { %792 = vadd.xlane.f32.xlu0 %v951_v39 }
0x1282   :  { %v953_v40 = vpop.eup %952 }
0x1283   :  { %v799_v41 = vmul.f32 0.6931472, %v953_v40  ;;  %v789_v42 = vpop.xlane.xlu1 %788 }
0x1284   :  { %954 = vlog2.f32 %v789_v42 }
0x1285   :  { %v813_v43 = vsub.f32 %v757_v14, %v799_v41  ;;  %956 = vpow2.f32 %v768_v46 }
0x1286   :  { %958 = vpow2.f32 %v774_v50 }
0x1287   :  { %821 = vst [vmem:[%s1228_s6 + $0x8] sm:$0xff] %v813_v43 }
0x128a   :  { %v955_v9 = vpop.eup %954 }
0x128b   :  { %v805_v11 = vmul.f32 0.6931472, %v955_v9  ;;  %v957_v52 = vpop.eup %956 }
0x128c   :  { %v959_v53 = vpop.eup %958 }
0x128d   :  { %v816_v44 = vsub.f32 %v760_v19, %v805_v11 }
0x128f   :  { %824 = vst [vmem:[%s1228_s6 + $0x20] sm:$0xff] %v816_v44 }
0x12cc   :  { %v737_v47 = vpop.f32.mrf.mxu3 }
0x12cd   :  { %v738_v48 = vadd.f32 %v1180_v51, %v737_v47 }
0x12cf   :  { %754 = vmax.xlane.f32.xlu2 %v738_v48 }
0x12d7   :  { %784 = vadd.xlane.f32.xlu2 %v957_v52 }
0x12df   :  { %790 = vadd.xlane.f32.xlu2 %v959_v53 }
0x12f2   :  { %v793_v54 = vpop.xlane.xlu0 %792 }
0x12f3   :  { %960 = vlog2.f32 %v793_v54 }
0x12f9   :  { %v961_v55 = vpop.eup %960 }
0x12fa   :  { %v809_v56 = vmul.f32 0.6931472, %v961_v55 }
0x12fc   :  { %v818_v57 = vsub.f32 %v762_v36, %v809_v56 }
0x12fe   :  { %826 = vst [vmem:[%s1228_s6 + $0x30] sm:$0xff] %v818_v57 }
0x1342   :  { %v755_v51 = vpop.xlane.xlu2 %754 }
0x1343   :  { %v763_v58 = vsub.f32 %v738_v48, %v755_v51 }
0x1345   :  { %v778_v59 = vmul.f32 1.442695, %v763_v58 }
0x1347   :  { %962 = vpow2.f32 %v778_v59 }
0x134a   :  { %v785_v60 = vpop.xlane.xlu2 %784 }
0x134b   :  { %964 = vlog2.f32 %v785_v60 }
0x134d   :  { %v963_v61 = vpop.eup %962 }
0x134e   :  { %794 = vadd.xlane.f32.xlu1 %v963_v61 }
0x1351   :  { %v965_v62 = vpop.eup %964 }
0x1352   :  { %v801_v63 = vmul.f32 0.6931472, %v965_v62  ;;  %v791_v0 = vpop.xlane.xlu2 %790 }
0x1353   :  { %966 = vlog2.f32 %v791_v0 }
0x1354   :  { %v814_v1 = vsub.f32 %v758_v45, %v801_v63 }
0x1356   :  { %822 = vst [vmem:[%s1228_s6 + $0x10] sm:$0xff] %v814_v1 }
0x1359   :  { %v967_v2 = vpop.eup %966 }
0x135a   :  { %v807_v3 = vmul.f32 0.6931472, %v967_v2 }
0x135c   :  { %v817_v4 = vsub.f32 %v761_v49, %v807_v3 }
0x135e   :  { %825 = vst [vmem:[%s1228_s6 + $0x28] sm:$0xff] %v817_v4 }
0x13c1   :  { %v795_v5 = vpop.xlane.xlu1 %794 }
0x13c2   :  { %968 = vlog2.f32 %v795_v5 }
0x13c8   :  { %v969_v6 = vpop.eup %968 }
0x13c9   :  { %v811_v7 = vmul.f32 0.6931472, %v969_v6 }
0x13cb   :  { %v819_v8 = vsub.f32 %v763_v58, %v811_v7 }
0x13cd   :  { %827 = vst [vmem:[%s1228_s6 + $0x38] sm:$0xff] %v819_v8 }

</bundles_post_ra>
